<compile_context>
chip_gen: v6e
topology: v6e:2x2x1
jax: 0.10.0
libtpu: 0.0.40
codegen_flags: <defaults>
</compile_context>

<pallas_src>
from functools import partial

import jax
import jax.numpy as jnp
from jax import lax
from jax.experimental import pallas as pl
from jax.experimental.pallas import tpu as pltpu


def _scale_norm_kernel(scale_ref, x_ref, o_ref, *, eps):
    # scale_ref: (1,) f32 in SMEM; x_ref/o_ref: (block_rows, D) in VMEM.
    x = x_ref[...].astype(jnp.float32)
    sq = jnp.sum(x * x, axis=-1, keepdims=True)            # (block_rows, 1)
    # clamp(||x||, min=eps) == sqrt(max(sq, eps^2)); rsqrt -> EUP slot.
    factor = scale_ref[0] * lax.rsqrt(jnp.maximum(sq, eps * eps))
    o_ref[...] = (x * factor).astype(o_ref.dtype)


def _choose_block_rows(n, d, itemsize):
    """Largest row tile under a ~8 MiB pipeline-buffer budget.

    Buffers = input + output, each double-buffered -> 4 * rows * d * itemsize
    bytes.  8 MiB sits safely under v5e's 16 MiB default scoped VMEM and
    v7x's 64 MiB physical VMEM while amortising the ~0.35 us per-grid-step
    overhead (gains flatten past ~512-1024 rows).
    """
    budget_bytes = 8 * 1024 * 1024
    per_row_bytes = 4 * d * itemsize
    rows = min(budget_bytes // max(per_row_bytes, 1), 1024)
    # Sublane packing granularity: 8 rows (f32), 16 (bf16/f16), 32 (8-bit).
    sub = max(8, 32 // max(itemsize, 1))
    rows = max(sub, (rows // sub) * sub)
    # Never make the block (much) taller than the array itself.
    rows = min(rows, max(sub, -(-n // sub) * sub))
    # Keep >= 2 grid steps when there is enough work so both v7x TensorCores
    # get rows (grid axis is marked "parallel").
    if n >= 2 * sub:
        rows = min(rows, max(sub, (((n + 1) // 2) // sub) * sub))
    return int(rows)


def scale_norm(x, scale, eps=1e-5, block_rows=None):
    """Pallas ScaleNorm.  x: (..., D); scale: scalar parameter."""
    orig_shape = x.shape
    d = orig_shape[-1]
    x2 = x.reshape(-1, d)
    n = x2.shape[0]

    itemsize = jnp.dtype(x.dtype).itemsize
    if block_rows is None:
        block_rows = _choose_block_rows(n, d, itemsize)

    grid = (pl.cdiv(n, block_rows),)  # ragged last block is masked by Pallas

    scale_arr = jnp.asarray(scale, dtype=jnp.float32).reshape((1,))

    out = pl.pallas_call(
        partial(_scale_norm_kernel, eps=float(eps)),
        out_shape=jax.ShapeDtypeStruct((n, d), x.dtype),
        grid_spec=pltpu.PrefetchScalarGridSpec(
            num_scalar_prefetch=0,
            grid=grid,
            in_specs=[
                pl.BlockSpec(memory_space=pltpu.SMEM),              # scale (scalar)
                pl.BlockSpec((block_rows, d), lambda i: (i, 0)),    # x row tile
            ],
            out_specs=pl.BlockSpec((block_rows, d), lambda i: (i, 0)),
        ),
        compiler_params=pltpu.CompilerParams(
            dimension_semantics=("parallel",),
            vmem_limit_bytes=32 * 1024 * 1024,
        ),
    )(scale_arr, x2)

    return out.reshape(orig_shape)


def _reference(x, scale, eps):
    xf = x.astype(jnp.float32)
    norm = jnp.maximum(jnp.linalg.norm(xf, axis=-1, keepdims=True), eps)
    return (xf * (scale / norm)).astype(x.dtype)


if __name__ == "__main__":
    eps = 1e-5
    key = jax.random.PRNGKey(0)

    # Shapes consistent with the module's usage: (batch, seq, hidden).
    batch, seq, hidden = 2, 8, 32
    scale = float(hidden) ** 0.5  # typical ScaleNorm init: sqrt(hidden)

    k1, k2, k3 = jax.random.split(key, 3)

    # 1) f32, evenly divisible row count.
    x = jax.random.normal(k1, (batch, seq, hidden), dtype=jnp.float32)
    out = jax.block_until_ready(scale_norm(x, scale, eps=eps))
    assert out.shape == x.shape and out.dtype == x.dtype
    assert jnp.allclose(out, _reference(x, scale, eps), atol=1e-5, rtol=1e-5)

    # 2) f32, ragged row count (exercises the masked last block).
    xr = jax.random.normal(k2, (3, 7, hidden), dtype=jnp.float32)
    outr = jax.block_until_ready(scale_norm(xr, scale, eps=eps))
    assert jnp.allclose(outr, _reference(xr, scale, eps), atol=1e-5, rtol=1e-5)

    # 3) bf16 input (16-row sublane packing path), f32 accumulation in-kernel.
    xb = jax.random.normal(k3, (batch, seq, hidden), dtype=jnp.bfloat16)
    outb = jax.block_until_ready(scale_norm(xb, scale, eps=eps))
    assert outb.dtype == jnp.bfloat16
    assert jnp.allclose(outb.astype(jnp.float32),
                        _reference(xb, scale, eps).astype(jnp.float32),
                        atol=2e-2, rtol=2e-2)

    print("KERNEL_OK")
</pallas_src>

<mosaic_0001>
module attributes {stable_mosaic.version = 11 : i64} {
  func.func @_scale_norm_kernel(%arg0: i32, %arg1: memref<1xf32, #tpu.memory_space<smem>>, %arg2: memref<8x32xf32, #tpu.memory_space<vmem>>, %arg3: memref<8x32xf32, #tpu.memory_space<vmem>>) attributes {dimension_semantics = [#tpu.dimension_semantics<parallel>], iteration_bounds = array<i64: 2>, scalar_prefetch = 0 : i64, scratch_operands = 0 : i64, tpu.core_type = #tpu.core_type<tc>, window_params = [{transform_indices = @transform_0, window_bounds = array<i64: 1>}, {transform_indices = @transform_1, window_bounds = array<i64: 8, 32>}, {transform_indices = @transform_2, window_bounds = array<i64: 8, 32>}]} {
    %c0 = arith.constant 0 : index
    %c0_0 = arith.constant 0 : index
    %0 = vector.load %arg2[%c0, %c0_0] : memref<8x32xf32, #tpu.memory_space<vmem>>, vector<8x32xf32>
    %1 = arith.mulf %0, %0 : vector<8x32xf32>
    %cst = arith.constant dense<0.000000e+00> : vector<8xf32>
    %2 = vector.multi_reduction <add>, %1, %cst [1] : vector<8x32xf32> to vector<8xf32>
    %3 = vector.shape_cast %2 : vector<8xf32> to vector<8x1xf32>
    %c0_1 = arith.constant 0 : index
    %4 = memref.load %arg1[%c0_1] : memref<1xf32, #tpu.memory_space<smem>>
    %cst_2 = arith.constant 1.000000e-10 : f32
    %5 = vector.broadcast %cst_2 : f32 to vector<8x1xf32>
    %6 = arith.maximumf %3, %5 : vector<8x1xf32>
    %7 = math.rsqrt %6 : vector<8x1xf32>
    %8 = vector.broadcast %4 : f32 to vector<8x1xf32>
    %9 = arith.mulf %8, %7 : vector<8x1xf32>
    %10 = vector.broadcast %9 : vector<8x1xf32> to vector<8x32xf32>
    %11 = arith.mulf %0, %10 : vector<8x32xf32>
    %c0_3 = arith.constant 0 : index
    %c0_4 = arith.constant 0 : index
    %12 = vector.load %arg3[%c0_3, %c0_4] : memref<8x32xf32, #tpu.memory_space<vmem>>, vector<8x32xf32>
    tpu.vector_store %arg3[%c0_3, %c0_4], %11 {strides = array<i32>} : memref<8x32xf32, #tpu.memory_space<vmem>>, vector<8x32xf32>,
    return
  }
  func.func @transform_0(%arg0: i32) -> i32 {
    %c0_i32 = arith.constant 0 : i32
    %c0_i32_0 = arith.constant 0 : i32
    return %c0_i32 : i32
  }
  func.func @transform_1(%arg0: i32) -> (i32, i32) {
    %c0_i32 = arith.constant 0 : i32
    %c0_i32_0 = arith.constant 0 : i32
    return %arg0, %c0_i32 : i32, i32
  }
  func.func @transform_2(%arg0: i32) -> (i32, i32) {
    %c0_i32 = arith.constant 0 : i32
    %c0_i32_0 = arith.constant 0 : i32
    return %arg0, %c0_i32 : i32, i32
  }
}

</mosaic_0001>

<bundles_post_ra>
// kernel: tpu_custom_call.1
= control target key start
LH: loop header
LB: loop body
LE: loop exit
PB: predicated region body
PF: predicated region fallthrough
CT: control target
= control target key end

     0   :  { %s574_s0 = inlined_call_operand.<no memory space> [shape: f32[1], index: 0, kind: input, shape index: {}]   ;;  %s575_s1 = inlined_call_operand.hbm [shape: f32[16,32], index: 1, kind: input, shape index: {}]   ;;  %s576_s2 = inlined_call_operand.hbm [shape: f32[16,32], index: 2, kind: output, shape index: {}]  }
   0x1   :  { %7 = sst [smem:[#allocation2]] %s574_s0 }
   0x2   :  { %8 = vsyncpa [#allocation4], 0 }
   0x3   :  { %10 = vsyncpa [#allocation4 + $0x1], 0 }
   0x4   :  { %11 = vsyncpa [#allocation5], 0 }
   0x5   :  { %13 = vsyncpa [#allocation5 + $0x1], 0  ;;  %s431_s11 = smov 0   ;;  %s433_s12 = smov 0  }
   0x6   :  { %s435_s13 = smov 0   ;;  %s437_s14 = smov 0  }
   0x7 LB: > { %s452_s0 = sadd.s32 4294967295, %s409_s14   ;;  %s257_s15 = sadd.s32 4294967294, %s409_s14   ;;  %s409_s14 = sphi %s437_s14, %s593_s14   ;;  %s405_s13 = sphi %s435_s13, %s592_s13   ;;  %s401_s12 = sphi %s433_s12, %s591_s12   ;;  %s397_s11 = sphi %s431_s11, %s590_s11  }
   0x8   : > { %s456_s16 = sadd.s32 1, %s409_s14   ;;  %s47_s17 = sadd.s32 1, %s405_s13 }
   0x9   : > { %s44_s18 = ssub.s32 %s409_s14, %s456_s16  ;;  %p54_p0 = scmp.ne.s32.totalorder %s405_s13, %s401_s12 }
   0xa   : > { %p45_p1 = scmp.eq.s32.totalorder %s44_s18, 0  ;;  %p55_p2 = scmp.eq.s32.totalorder %s409_s14, 0 }
   0xb   : > { %p60_p3 = scmp.ne.s32.totalorder %s401_s12, %s397_s11  ;;  %p61_p4 = scmp.eq.s32.totalorder %s452_s0, 0 }
   0xc   : > { %s468_s19 = scalar_select %p45_p1, %s405_s13, %s47_s17  }
   0xd   : > { %p470_p5 = por %p55_p2, %p54_p0  ;;  %p474_p6 = por %p61_p4, %p60_p3 }
   0xe   : > { %p84_p7 = scmp.eq.s32.totalorder %s452_s0, 1  ;;  %p90_p8 = scmp.eq.s32.totalorder %s257_s15, 1 }
   0xf   : > { %s580_s21 = scalar_select %p474_p6, 1, 0 }
  0x10   : > { %p281_p10 = scmp.lt.s32.totalorder %s409_s14, 2  ;;  %p481_p11 = por %p84_p7, %p54_p0 }
  0x11   : > { %p485_p12 = por %p90_p8, %p60_p3  ;;  %s113_s24 = sand.u32 1, %s405_s13  }
  0x12   : > { %s581_s22 = scalar_select %p481_p11, 1, 0 }
  0x13   : > { %s582_s23 = scalar_select %p485_p12, 1, 0 }
  0x14   : > { %s261_s25 = sshll.u32 %s409_s14, 7  ;;  %s260_s26 = sshll.u32 %s113_s24, 3 }
  0x15   : > { %s494_s29 = scalar_lea.hbm %s575_s1, %s261_s25  ;;  %s117_s30 = scalar_lea.vmem [#allocation3], %s260_s26 }
  0x16   : > { %s124_s3 = sshll.u32 %s117_s30, 4  ;;  %p498_p13 = pnand %p281_p10, %p470_p5  ;;  %s502_s3 = int_to_ptr.vmem [resolvable:$true] %s124_s3 }
  0x17   : > { %s114_s5 = scalar_lea.sflag [#allocation4], %s113_s24  ;;  %s317_s6 = scalar_lea.hbm %s494_s29, 128 }
  0x18   : > { %p318_p2 = scmp.ne.s32.totalorder %s494_s29, %s317_s6  ;;  %p319_p3 = pneg %p498_p13 }
  0x19   : > { %s322_s9 = scalar_lea.hbm %s575_s1, 256  ;;  %p323_p5 = scmp.lt.s32.totalorder %s494_s29, %s575_s1 }
  0x1a   : > { %p320_p4 = pnand %p319_p3, %p318_p2  ;;  %p324_p8 = scmp.lt.s32.totalorder %s322_s9, %s317_s6 }
  0x1c   : > { %p321_p7 = pneg %p320_p4  ;;  %p325_p10 = por %p324_p8, %p323_p5 }
  0x1e   : > { %p326_p9 = pnand %p325_p10, %p321_p7 }
  0x20   : > { %329 = shalt.err (!%p326_p9)
}
  0x21   : > { %s330_s17 = scalar_lea.vmem %s502_s3, 128  ;;  %s411_s18 = smov [#allocation3]  }
  0x22   : > { %p331_p0 = scmp.ne.s32.totalorder %s502_s3, %s330_s17  ;;  %s335_s20 = sshll.u32 %s411_s18, 4  ;;  %s336_s20 = int_to_ptr.vmem [resolvable:$false] %s335_s20 }
  0x23   : > { %s337_s24 = scalar_lea.vmem %s336_s20, 256  ;;  %p338_p4 = scmp.lt.s32.totalorder %s502_s3, %s336_s20 }
  0x24   : > { %p333_p1 = pnand %p331_p0, %p319_p3  ;;  %p339_p12 = scmp.lt.s32.totalorder %s337_s24, %s330_s17 }
  0x26   : > { %p334_p2 = pneg %p333_p1  ;;  %p340_p11 = por %p339_p12, %p338_p4 }
  0x28   : > { %p341_p6 = pnand %p340_p11, %p334_p2 }
  0x2a   : > { %344 = shalt.err (!%p341_p6)
}
  0x2b   : > { %276 = dma.hbm_to_vmem [thread:$0]  (!%p498_p13), %s494_s29, 128, %s502_s3, %s114_s5  }
  0x2c   : > { %p584_p9 = scmp.lt.s32.totalorder %s409_s14, 3  ;;  %p585_p7 = scmp.ge.s32.totalorder %s409_s14, 1 }
  0x2e   : > { %p130_p0 = pnand %p585_p7, %p584_p9 }
  0x2f   : > { %s529_s25 = sand.u32 (!%p130_p0), 1, %s401_s12   ;;  %p586_p6 = scmp.ne.s32.totalorder (!%p130_p0), %s580_s21, 0 }
  0x30   : > { %133 = sbr.rel (%p130_p0) target bundleno = 229 (0xe5), region = 28  ;;  %s263_s26 = sshll.u32 (!%p130_p0), %s529_s25, 3 }
  0x31   : > { %s136_s27 = scalar_lea.sflag (!%p130_p0), [#allocation4], %s529_s25  ;;  %s139_s28 = scalar_lea.vmem (!%p130_p0), [#allocation3], %s263_s26 }
  0x35   : > { %388 = dma.done.wait (%p586_p6), %s136_s27, 128  }
  0x36   : > { %390 = vsyncadd (%p586_p6), %s136_s27, 4294967168  ;;  %v160_v0 = vld [vmem:[%s139_s28] sm:$0xff]  ;;  %vm162_vm0 = vcmask 261120   ;;  %s166_s29 = sld [smem:[#allocation2]]  ;;  %s266_s30 = sshll.u32 %s452_s0, 7 }
  0x37   : > { %v161_v1 = vmul.f32 %v160_v0, %v160_v0  ;;  %s159_s3 = scalar_lea.vmem [#allocation6], %s263_s26  ;;  %s185_s6 = scalar_lea.hbm %s576_s2, %s266_s30 }
  0x38   : > { %s187_s4 = sshll.u32 %s159_s3, 4  ;;  %s174_s7 = scalar_lea.sflag [#allocation5], %s529_s25  ;;  %s188_s4 = int_to_ptr.vmem [resolvable:$true] %s187_s4 }
  0x39   : > { %v163_v2 = vsel %vm162_vm0, %v161_v1, 0.0  ;;  %s345_s8 = scalar_lea.vmem %s188_s4, 128  ;;  %p587_p12 = scmp.ne.s32.totalorder %s581_s22, 0 }
  0x3a   : > { %164 = vadd.xlane.f32.xlu0 %v163_v2  ;;  %p346_p11 = scmp.ne.s32.totalorder %s188_s4, %s345_s8  ;;  %s412_s9 = smov [#allocation6]  }
  0x3b   : > { %s349_s10 = sshll.u32 %s412_s9, 4  ;;  %s350_s10 = int_to_ptr.vmem [resolvable:$false] %s349_s10 }
  0x3c   : > { %v169_v5 = vstv %s166_s29  ;;  %p347_p13 = pnand %p346_p11, %p587_p12  ;;  %s351_s0 = scalar_lea.vmem %s350_s10, 256 }
  0x3d   : > { %p352_p3 = scmp.lt.s32.totalorder %s188_s4, %s350_s10  ;;  %p353_p5 = scmp.lt.s32.totalorder %s351_s0, %s345_s8 }
  0x3e   : > { %p348_p1 = pneg %p347_p13 }
  0x3f   : > { %p354_p8 = por %p353_p5, %p352_p3 }
  0x41   : > { %p355_p10 = pnand %p354_p8, %p348_p1 }
  0xc3   : > { %v165_v3 = vpop.xlane.xlu0 %164 }
  0xc4   : > { %v167_v4 = vmax.f32 %v165_v3, 1e-10 }
  0xc6   : > { %315 = vrsqrt.f32 %v167_v4 }
  0xd3   : > { %v316_v6 = vpop.eup %315 }
  0xd4   : > { %v170_v7 = vmul.f32 %v316_v6, %v169_v5 }
  0xd6   : > { %v171_v8 = vmul.f32 %v170_v7, %v160_v0 }
  0xd8   : > { %172 = vst.msk [vmem:[%s159_s3] sm:$0xff] %vm162_vm0, %v171_v8 }
  0xd9   : > { %358 = shalt.err (!%p355_p10)
}
  0xda   : > { %s359_s15 = scalar_lea.hbm %s185_s6, 128  ;;  %s363_s20 = scalar_lea.hbm %s576_s2, 256 }
  0xdb   : > { %p360_p2 = scmp.ne.s32.totalorder %s185_s6, %s359_s15  ;;  %p364_p7 = scmp.lt.s32.totalorder %s185_s6, %s576_s2 }
  0xdc   : > { %p365_p0 = scmp.lt.s32.totalorder %s363_s20, %s359_s15 }
  0xdd   : > { %p361_p4 = pnand %p360_p2, %p587_p12 }
  0xde   : > { %p366_p6 = por %p365_p0, %p364_p7 }
  0xdf   : > { %p362_p9 = pneg %p361_p4 }
  0xe1   : > { %p367_p11 = pnand %p366_p6, %p362_p9 }
  0xe3   : > { %370 = shalt.err (!%p367_p11)
}
  0xe4   : > { %271 = dma.vmem_to_hbm [thread:$0]  (%p587_p12), %s188_s4, 128, %s185_s6, %s174_s7  }
  0xe5 PF: > { %s199_s26 = sand.u32 1, %s397_s11   ;;  %p588_p13 = scmp.ne.s32.totalorder %s582_s23, 0 }
  0xe6   : > { %p589_p1 = scmp.ge.s32.totalorder %s409_s14, 2  ;;  %s200_s27 = scalar_lea.sflag [#allocation5], %s199_s26 }
  0xe8   : > { %p278_p3 = pnand %p589_p1, %p588_p13 }
  0xea   : > { %p279_p5 = pneg %p278_p3 }
  0xec   : > { %392 = dma.done.wait (%p279_p5), %s200_s27, 128  }
  0xed   : > { %394 = vsyncadd (%p279_p5), %s200_s27, 4294967168  ;;  %p16_p8 = scmp.ge.s32.totalorder %s456_s16, 4   ;;  %s590_s11 = smov %s401_s12 }
  0xee   : > { %s591_s12 = smov %s405_s13  ;;  %s592_s13 = smov %s468_s19 }
  0xef   : > { %s593_s14 = smov %s456_s16  ;;  %18 = sbr.rel (!%p16_p8) target bundleno = 7 (0x7), region = 73 }
  0xf4   :  { %205 = vsyncpa [#allocation4], 1 }
  0xf5   :  { %207 = vsyncpa [#allocation4 + $0x1], 1 }
  0xf6   :  { %208 = vsyncpa [#allocation5], 1 }
  0xf7   :  { %210 = vsyncpa [#allocation5 + $0x1], 1 }

</bundles_post_ra>
